<compile_context>
chip_gen: v5e
topology: v5e:2x2
jax: 0.10.0
libtpu: 0.0.40
codegen_flags: <defaults>
</compile_context>

<pallas_src>
import math

import jax
import jax.numpy as jnp
from jax.experimental import pallas as pl
from jax.experimental.pallas import tpu as pltpu


# ----------------------------------------------------------------------------
# Pallas kernels
# ----------------------------------------------------------------------------
def _make_ra_kernel(has_mask: bool):
    """RelationAttention (+ outer residual) over the whole batch in one step."""

    def kernel(*refs):
        if has_mask:
            (p_ref, x_ref, wv_ref, pack_ref, scal_ref, bias_ref, out_ref) = refs
        else:
            (p_ref, x_ref, wv_ref, pack_ref, scal_ref, out_ref) = refs
            bias_ref = None

        p = p_ref[...]                       # (B, Nq, Hp) f32 (query / residual)
        x = x_ref[...]                       # (B, Nk, Hp) f32 (key / value)
        bsz, nq, hp = p.shape
        nk = x.shape[1]

        pack = pack_ref[...]                 # (8, Hp) f32, lane-dense pack
        fk = pack[0:1, :]                    # folded key-side score vector
        fq = pack[1:2, :]                    # folded query-side score vector
        wg1 = pack[2:3, :]                   # gate weight on `out`
        wg2 = pack[3:4, :]                   # gate weight on `p`
        bv = pack[4:5, :]                    # value-projection bias
        cs = scal_ref[0]                     # folded score bias (bs + bq.ws1 + bk.ws2)
        bg = scal_ref[1]                     # gate bias

        # ---- value projection: single MXU call on the flattened slab ----
        v = jnp.dot(x.reshape(bsz * nk, hp).astype(jnp.bfloat16), wv_ref[...],
                    preferred_element_type=jnp.float32).reshape(bsz, nk, hp)

        # ---- pairwise score (rank-1): VPU multiply + lane reduce ----
        sq = jnp.sum(p * fq, axis=-1, keepdims=True)       # (B, Nq, 1)
        sk = jnp.sum(x * fk, axis=-1)                      # (B, Nk)
        score = sq + sk[:, None, :] + cs                   # (B, Nq, Nk)
        if has_mask:
            score = score + bias_ref[...]                  # additive -1e9 mask bias

        # ---- softmax over keys (f32; reciprocal on the EUP) ----
        score = score - jnp.max(score, axis=-1, keepdims=True)
        e = jnp.exp(score)
        attn = e * pl.reciprocal(jnp.sum(e, axis=-1, keepdims=True), approx=True)

        # ---- attention-weighted value; bv folded in after the einsum
        #      (softmax rows sum to one) + inner residual ----
        out = jnp.einsum('bqk,bkh->bqh', attn, v,
                         preferred_element_type=jnp.float32) + bv + p

        # ---- gated mix, with the OUTER (+p) residual folded into the write ----
        gl = (jnp.sum(out * wg1, axis=-1, keepdims=True)
              + jnp.sum(p * wg2, axis=-1, keepdims=True) + bg)
        g = jax.nn.sigmoid(gl)
        out_ref[...] = (g * out + (1.0 - g) * p + p).astype(out_ref.dtype)

    return kernel


def head_kernel(p_ref, e12_ref, w1p_ref, w1e_ref, b1_ref, w2_ref, b2_ref, out_ref):
    """sigmoid(fc2(tanh(fc1([p|e1|e2])))) without materializing the concat."""
    p = p_ref[...]                                          # (B, C, Hp) f32
    bsz, c, hp = p.shape
    # fc1 split: per-(b,c) part on p, per-batch part on [e1|e2]
    hp_part = jnp.dot(p.reshape(bsz * c, hp).astype(jnp.bfloat16), w1p_ref[...],
                      preferred_element_type=jnp.float32).reshape(bsz, c, hp)
    he = jnp.dot(e12_ref[...].astype(jnp.bfloat16), w1e_ref[...],
                 preferred_element_type=jnp.float32)        # (B, Hp), once per batch
    h = jnp.tanh(hp_part + he[:, None, :] + b1_ref[...])
    # fc2 is a rank-1 projection: VPU multiply + lane reduce, not an N=1 MXU op
    logit = jnp.sum(h * w2_ref[...], axis=-1) + b2_ref[0]
    out_ref[...] = jax.nn.sigmoid(logit).astype(out_ref.dtype)   # (B, C)


# ----------------------------------------------------------------------------
# Pallas wrappers
# ----------------------------------------------------------------------------
def relation_attention(p, x, bias, prep):
    """p: (B,Nq,Hp) query/residual side, x: (B,Nk,Hp) key/value side.
    Returns RelationAttention(p, x, mask) + p (outer residual folded in)."""
    B, Nq, Hp = p.shape
    vmem = pl.BlockSpec(memory_space=pltpu.MemorySpace.VMEM)
    smem = pl.BlockSpec(memory_space=pltpu.MemorySpace.SMEM)

    args = [p, x, prep["wv"], prep["pack"], prep["scal"]]
    in_specs = [vmem, vmem, vmem, vmem, smem]
    if bias is not None:
        args.append(bias)                  # precomputed additive -1e9 mask bias
        in_specs.append(vmem)

    # TODO(synk): on v7x (2 TensorCores) add a "parallel" grid axis over
    # (B*Nq) row tiles once shapes are large enough to feed both cores.
    return pl.pallas_call(
        _make_ra_kernel(bias is not None),
        out_shape=jax.ShapeDtypeStruct((B, Nq, Hp), jnp.float32),
        in_specs=in_specs,
        out_specs=vmem,
    )(*args)


def head(p, e12, w1p, w1e, b1, w2row, b2):
    """p: (B,C,Hp), e12: (B,2Hp) -> (B, C) probabilities."""
    B, C, _ = p.shape
    vmem = pl.BlockSpec(memory_space=pltpu.MemorySpace.VMEM)
    smem = pl.BlockSpec(memory_space=pltpu.MemorySpace.SMEM)
    return pl.pallas_call(
        head_kernel,
        out_shape=jax.ShapeDtypeStruct((B, C), jnp.float32),
        in_specs=[vmem, vmem, vmem, vmem, vmem, vmem, smem],
        out_specs=vmem,
    )(p, e12, w1p, w1e, b1, w2row, b2)


# ----------------------------------------------------------------------------
# Weight folding / padding (trace-time glue)
# ----------------------------------------------------------------------------
def _round_up(n, m):
    return ((n + m - 1) // m) * m


def _pad_last(a, target):
    pad = target - a.shape[-1]
    if pad == 0:
        return a
    return jnp.pad(a, [(0, 0)] * (a.ndim - 1) + [(0, pad)])


def prep_relation_attention(pr, H, Hp):
    """Fold Wq/Wk into the score linear and pack/pad operands lane-dense."""
    ws1 = pr["Ws"][0, :H]                       # score weight on q
    ws2 = pr["Ws"][0, H:]                       # score weight on k
    fq = pr["Wq"].T @ ws1                       # (H,) folded query score vector
    fk = pr["Wk"].T @ ws2                       # (H,) folded key score vector
    cs = pr["bs"][0] + pr["bq"] @ ws1 + pr["bk"] @ ws2
    wg1 = pr["Wg"][0, :H]
    wg2 = pr["Wg"][0, H:]

    pack = jnp.zeros((8, Hp), jnp.float32)      # one sublane-aligned operand
    pack = (pack.at[0, :H].set(fk)
                 .at[1, :H].set(fq)
                 .at[2, :H].set(wg1)
                 .at[3, :H].set(wg2)
                 .at[4, :H].set(pr["bv"]))
    wv = jnp.zeros((Hp, Hp), jnp.float32).at[:H, :H].set(pr["Wv"].T)
    return dict(
        wv=wv.astype(jnp.bfloat16),                              # MXU operand in bf16
        pack=pack,                                               # (8, Hp) f32
        scal=jnp.stack([cs, pr["bg"][0]]).astype(jnp.float32),   # SMEM scalars
    )


# ----------------------------------------------------------------------------
# HGAT forward (Pallas-backed)
# ----------------------------------------------------------------------------
def entity_trans_avg(x, pos):
    # x: (B, L, H*), pos: (B, L) {0,1}; pool_type == 'avg'
    weighted = x * pos[:, :, None]
    return jnp.sum(weighted, axis=1) / jnp.sum(pos, axis=1, keepdims=True)


@jax.jit
def hgat_forward(params, x, pos1, pos2, mask):
    B, L, H = x.shape
    C = params["embedding"].shape[0]
    Hp = _round_up(H, 128)                    # lane-dense hidden size

    # p = relation(embedding(arange(C))) — embedding of arange(C) is the table
    p0 = params["embedding"] @ params["Wrel"].T + params["brel"]       # (C, H)
    p = jnp.broadcast_to(_pad_last(p0, Hp)[None], (B, C, Hp))
    xp = _pad_last(x, Hp)                                              # (B, L, Hp)

    # additive softmax bias: 0 where kept, -1e9 where masked.  Built ONCE and
    # reused by every layer's masked (ra2) call.
    bias = ((mask.astype(jnp.float32) - 1.0) * 1e9).reshape(B, 1, L)

    for layer in params["layers"]:
        prep1 = prep_relation_attention(layer["ra1"], H, Hp)
        prep2 = prep_relation_attention(layer["ra2"], H, Hp)
        xp = relation_attention(xp, p, None, prep1)    # x = ra1(x, p) + x
        p = relation_attention(p, xp, bias, prep2)     # p = ra2(p, x, mask) + p

    e1 = entity_trans_avg(xp, pos1)       # (B, Hp); padded cols stay zero
    e2 = entity_trans_avg(xp, pos2)
    e12 = jnp.concatenate([e1, e2], axis=-1)                           # (B, 2Hp)

    # Head weights laid out for the split fc1 ( p-part | [e1|e2]-part )
    W1 = params["fc1"]["W"]                                            # (H, 3H)
    w1p = jnp.zeros((Hp, Hp), jnp.float32).at[:H, :H].set(W1[:, :H].T)
    w1e = (jnp.zeros((2 * Hp, Hp), jnp.float32)
             .at[0:H, :H].set(W1[:, H:2 * H].T)
             .at[Hp:Hp + H, :H].set(W1[:, 2 * H:3 * H].T))
    b1p = _pad_last(params["fc1"]["b"].reshape(1, H), Hp)
    w2row = _pad_last(params["fc2"]["W"].reshape(1, H), Hp)            # (1, Hp)
    b2 = params["fc2"]["b"].reshape(1)

    return head(p, e12, w1p.astype(jnp.bfloat16), w1e.astype(jnp.bfloat16),
                b1p, w2row, b2)                                        # (B, C)


# ----------------------------------------------------------------------------
# Pure-JAX reference (mirrors the PyTorch module literally) for validation
# ----------------------------------------------------------------------------
def _ra_ref(p, x, mask, pr):
    q = p @ pr["Wq"].T + pr["bq"]
    k = x @ pr["Wk"].T + pr["bk"]
    B, Np, H = q.shape
    Nx = k.shape[1]
    qe = jnp.broadcast_to(q[:, :, None, :], (B, Np, Nx, H))
    ke = jnp.broadcast_to(k[:, None, :, :], (B, Np, Nx, H))
    temp = jnp.concatenate([qe, ke], axis=3)
    score = (temp @ pr["Ws"].T + pr["bs"])[..., 0]
    if mask is not None:
        inv = 1.0 - mask[:, None, :]
        score = jnp.where(inv == 1.0, -1e9, score)
    score = jax.nn.softmax(score, axis=2)
    v = x @ pr["Wv"].T + pr["bv"]
    out = jnp.einsum("bcl,bld->bcd", score, v) + p
    g = jax.nn.sigmoid(jnp.concatenate([out, p], 2) @ pr["Wg"].T + pr["bg"])
    return g * out + (1.0 - g) * p


def hgat_ref(params, x, pos1, pos2, mask):
    B, L, H = x.shape
    C = params["embedding"].shape[0]
    p0 = params["embedding"] @ params["Wrel"].T + params["brel"]
    p = jnp.broadcast_to(p0[None], (B, C, H))
    for layer in params["layers"]:
        x = _ra_ref(x, p, None, layer["ra1"]) + x
        p = _ra_ref(p, x, mask, layer["ra2"]) + p
    e1 = entity_trans_avg(x, pos1)
    e2 = entity_trans_avg(x, pos2)
    pcat = jnp.concatenate(
        [p, jnp.broadcast_to(e1[:, None, :], (B, C, H)),
         jnp.broadcast_to(e2[:, None, :], (B, C, H))], axis=2)
    h = jnp.tanh(pcat @ params["fc1"]["W"].T + params["fc1"]["b"])
    return jax.nn.sigmoid((h @ params["fc2"]["W"].T + params["fc2"]["b"])[..., 0])


# ----------------------------------------------------------------------------
# Parameter init (PyTorch-default-style, deterministic)
# ----------------------------------------------------------------------------
def init_linear(key, in_dim, out_dim):
    k1, k2 = jax.random.split(key)
    bound = 1.0 / math.sqrt(in_dim)
    W = jax.random.uniform(k1, (out_dim, in_dim), jnp.float32, -bound, bound)
    b = jax.random.uniform(k2, (out_dim,), jnp.float32, -bound, bound)
    return W, b


def init_relation_attention(key, H):
    ks = jax.random.split(key, 5)
    Wq, bq = init_linear(ks[0], H, H)
    Wk, bk = init_linear(ks[1], H, H)
    Wv, bv = init_linear(ks[2], H, H)
    Ws, bs = init_linear(ks[3], 2 * H, 1)
    Wg, bg = init_linear(ks[4], 2 * H, 1)
    return dict(Wq=Wq, bq=bq, Wk=Wk, bk=bk, Wv=Wv, bv=bv,
                Ws=Ws, bs=bs, Wg=Wg, bg=bg)


def init_hgat(key, H, C, n_layers):
    ks = jax.random.split(key, 4 + 2 * n_layers)
    emb = jax.random.normal(ks[0], (C, H), jnp.float32)
    Wrel, brel = init_linear(ks[1], H, H)
    W1, b1 = init_linear(ks[2], 3 * H, H)
    W2, b2 = init_linear(ks[3], H, 1)
    layers = []
    for i in range(n_layers):
        layers.append(dict(ra1=init_relation_attention(ks[4 + 2 * i], H),
                           ra2=init_relation_attention(ks[5 + 2 * i], H)))
    return dict(embedding=emb, Wrel=Wrel, brel=brel,
                fc1=dict(W=W1, b=b1), fc2=dict(W=W2, b=b2), layers=layers)


# ----------------------------------------------------------------------------
if __name__ == "__main__":
    B, L, H, C, NLAYERS = 2, 8, 32, 8, 2   # batch, seq, hidden, class_nums, gat_layers

    key = jax.random.PRNGKey(0)
    kp, kx = jax.random.split(key)
    params = init_hgat(kp, H, C, NLAYERS)

    x = jax.random.normal(kx, (B, L, H), jnp.float32)
    pos1 = jnp.zeros((B, L), jnp.float32).at[:, 1:3].set(1.0)   # entity-1 span
    pos2 = jnp.zeros((B, L), jnp.float32).at[:, 4:6].set(1.0)   # entity-2 span
    mask = jnp.ones((B, L), jnp.float32).at[1, 6:].set(0.0)     # padding in batch 1

    out = jax.block_until_ready(hgat_forward(params, x, pos1, pos2, mask))
    ref = jax.block_until_ready(hgat_ref(params, x, pos1, pos2, mask))

    assert out.shape == (B, C), out.shape
    # 5e-3 tolerance absorbs bf16 MXU operands + approx-reciprocal softmax
    # vs. the all-f32 reference.
    assert jnp.allclose(out, ref, atol=5e-3, rtol=5e-3), (out, ref)
    print("KERNEL_OK")
</pallas_src>

<mosaic_0001>
module attributes {stable_mosaic.version = 11 : i64} {
  func.func @kernel(%arg0: memref<2x8x128xf32, #tpu.memory_space<vmem>>, %arg1: memref<2x8x128xf32, #tpu.memory_space<vmem>>, %arg2: memref<128x128xbf16, #tpu.memory_space<vmem>>, %arg3: memref<8x128xf32, #tpu.memory_space<vmem>>, %arg4: memref<2xf32, #tpu.memory_space<smem>>, %arg5: memref<2x8x128xf32, #tpu.memory_space<vmem>>) attributes {dimension_semantics = [], scalar_prefetch = 0 : i64, scratch_operands = 0 : i64, tpu.core_type = #tpu.core_type<tc>} {
    %c0 = arith.constant 0 : index
    %c0_0 = arith.constant 0 : index
    %c0_1 = arith.constant 0 : index
    %0 = vector.load %arg0[%c0, %c0_0, %c0_1] : memref<2x8x128xf32, #tpu.memory_space<vmem>>, vector<2x8x128xf32>
    %c0_2 = arith.constant 0 : index
    %c0_3 = arith.constant 0 : index
    %c0_4 = arith.constant 0 : index
    %1 = vector.load %arg1[%c0_2, %c0_3, %c0_4] : memref<2x8x128xf32, #tpu.memory_space<vmem>>, vector<2x8x128xf32>
    %c0_5 = arith.constant 0 : index
    %c0_6 = arith.constant 0 : index
    %2 = vector.load %arg3[%c0_5, %c0_6] : memref<8x128xf32, #tpu.memory_space<vmem>>, vector<8x128xf32>
    %3 = vector.extract_strided_slice %2 {offsets = [0, 0], sizes = [1, 128], strides = [1, 1]} : vector<8x128xf32> to vector<1x128xf32>
    %4 = vector.extract_strided_slice %2 {offsets = [1, 0], sizes = [1, 128], strides = [1, 1]} : vector<8x128xf32> to vector<1x128xf32>
    %5 = vector.extract_strided_slice %2 {offsets = [2, 0], sizes = [1, 128], strides = [1, 1]} : vector<8x128xf32> to vector<1x128xf32>
    %6 = vector.extract_strided_slice %2 {offsets = [3, 0], sizes = [1, 128], strides = [1, 1]} : vector<8x128xf32> to vector<1x128xf32>
    %7 = vector.extract_strided_slice %2 {offsets = [4, 0], sizes = [1, 128], strides = [1, 1]} : vector<8x128xf32> to vector<1x128xf32>
    %c0_7 = arith.constant 0 : index
    %8 = memref.load %arg4[%c0_7] : memref<2xf32, #tpu.memory_space<smem>>
    %c1 = arith.constant 1 : index
    %9 = memref.load %arg4[%c1] : memref<2xf32, #tpu.memory_space<smem>>
    %10 = vector.shape_cast %1 : vector<2x8x128xf32> to vector<16x128xf32>
    %11 = arith.truncf %10 : vector<16x128xf32> to vector<16x128xbf16>
    %c0_8 = arith.constant 0 : index
    %c0_9 = arith.constant 0 : index
    %12 = vector.load %arg2[%c0_8, %c0_9] : memref<128x128xbf16, #tpu.memory_space<vmem>>, vector<128x128xbf16>
    %cst = arith.constant dense<0.000000e+00> : vector<16x128xf32>
    %13 = tpu.matmul %11, %12, %cst {dimension_numbers = #tpu.dot_dimension_numbers<[1], [0], [0], [1], [0, 0, 1, 1], [], []>} : vector<16x128xbf16>, vector<128x128xbf16>, vector<16x128xf32> -> vector<16x128xf32>
    %14 = vector.shape_cast %13 : vector<16x128xf32> to vector<2x8x128xf32>
    %15 = vector.shape_cast %4 : vector<1x128xf32> to vector<1x1x128xf32>
    %16 = vector.broadcast %15 : vector<1x1x128xf32> to vector<2x8x128xf32>
    %17 = arith.mulf %0, %16 : vector<2x8x128xf32>
    %cst_10 = arith.constant dense<0.000000e+00> : vector<2x8xf32>
    %18 = vector.multi_reduction <add>, %17, %cst_10 [2] : vector<2x8x128xf32> to vector<2x8xf32>
    %19 = vector.shape_cast %18 : vector<2x8xf32> to vector<2x8x1xf32>
    %20 = vector.shape_cast %3 : vector<1x128xf32> to vector<1x1x128xf32>
    %21 = vector.broadcast %20 : vector<1x1x128xf32> to vector<2x8x128xf32>
    %22 = arith.mulf %1, %21 : vector<2x8x128xf32>
    %cst_11 = arith.constant dense<0.000000e+00> : vector<2x8xf32>
    %23 = vector.multi_reduction <add>, %22, %cst_11 [2] : vector<2x8x128xf32> to vector<2x8xf32>
    %24 = vector.shape_cast %23 : vector<2x8xf32> to vector<2x1x8xf32>
    %25 = vector.broadcast %19 : vector<2x8x1xf32> to vector<2x8x8xf32>
    %26 = vector.broadcast %24 : vector<2x1x8xf32> to vector<2x8x8xf32>
    %27 = arith.addf %25, %26 : vector<2x8x8xf32>
    %28 = vector.broadcast %8 : f32 to vector<2x8x8xf32>
    %29 = arith.addf %27, %28 : vector<2x8x8xf32>
    %cst_12 = arith.constant dense<0xFF800000> : vector<2x8xf32>
    %30 = vector.multi_reduction <maximumf>, %29, %cst_12 [2] : vector<2x8x8xf32> to vector<2x8xf32>
    %31 = vector.shape_cast %30 : vector<2x8xf32> to vector<2x8x1xf32>
    %32 = vector.broadcast %31 : vector<2x8x1xf32> to vector<2x8x8xf32>
    %33 = arith.subf %29, %32 : vector<2x8x8xf32>
    %34 = math.exp %33 : vector<2x8x8xf32>
    %cst_13 = arith.constant dense<0.000000e+00> : vector<2x8xf32>
    %35 = vector.multi_reduction <add>, %34, %cst_13 [2] : vector<2x8x8xf32> to vector<2x8xf32>
    %36 = vector.shape_cast %35 : vector<2x8xf32> to vector<2x8x1xf32>
    %37 = tpu.reciprocal %36 {approx = true} : vector<2x8x1xf32> -> vector<2x8x1xf32>
    %38 = vector.broadcast %37 : vector<2x8x1xf32> to vector<2x8x8xf32>
    %39 = arith.mulf %34, %38 : vector<2x8x8xf32>
    "tpu.trace_start"() <{level = 10 : i32, message = "bqk,bkh->bqh"}> : () -> ()
    %cst_14 = arith.constant dense<0.000000e+00> : vector<2x8x128xf32>
    %40 = tpu.matmul %39, %14, %cst_14 {dimension_numbers = #tpu.dot_dimension_numbers<[2], [1], [1], [2], [0, 0, 0, 1, 1, 2], [0], [0]>} : vector<2x8x8xf32>, vector<2x8x128xf32>, vector<2x8x128xf32> -> vector<2x8x128xf32>
    "tpu.trace_stop"() : () -> ()
    %41 = vector.shape_cast %7 : vector<1x128xf32> to vector<1x1x128xf32>
    %42 = vector.broadcast %41 : vector<1x1x128xf32> to vector<2x8x128xf32>
    %43 = arith.addf %40, %42 : vector<2x8x128xf32>
    %44 = arith.addf %43, %0 : vector<2x8x128xf32>
    %45 = vector.shape_cast %5 : vector<1x128xf32> to vector<1x1x128xf32>
    %46 = vector.broadcast %45 : vector<1x1x128xf32> to vector<2x8x128xf32>
    %47 = arith.mulf %44, %46 : vector<2x8x128xf32>
    %cst_15 = arith.constant dense<0.000000e+00> : vector<2x8xf32>
    %48 = vector.multi_reduction <add>, %47, %cst_15 [2] : vector<2x8x128xf32> to vector<2x8xf32>
    %49 = vector.shape_cast %48 : vector<2x8xf32> to vector<2x8x1xf32>
    %50 = vector.shape_cast %6 : vector<1x128xf32> to vector<1x1x128xf32>
    %51 = vector.broadcast %50 : vector<1x1x128xf32> to vector<2x8x128xf32>
    %52 = arith.mulf %0, %51 : vector<2x8x128xf32>
    %cst_16 = arith.constant dense<0.000000e+00> : vector<2x8xf32>
    %53 = vector.multi_reduction <add>, %52, %cst_16 [2] : vector<2x8x128xf32> to vector<2x8xf32>
    %54 = vector.shape_cast %53 : vector<2x8xf32> to vector<2x8x1xf32>
    %55 = arith.addf %49, %54 : vector<2x8x1xf32>
    %56 = vector.broadcast %9 : f32 to vector<2x8x1xf32>
    %57 = arith.addf %55, %56 : vector<2x8x1xf32>
    %58 = arith.negf %57 : vector<2x8x1xf32>
    %59 = math.exp %58 : vector<2x8x1xf32>
    %cst_17 = arith.constant 1.000000e+00 : f32
    %60 = vector.broadcast %cst_17 : f32 to vector<2x8x1xf32>
    %61 = arith.addf %60, %59 : vector<2x8x1xf32>
    %62 = arith.divf %60, %61 : vector<2x8x1xf32>
    %63 = vector.broadcast %62 : vector<2x8x1xf32> to vector<2x8x128xf32>
    %64 = arith.mulf %63, %44 : vector<2x8x128xf32>
    %cst_18 = arith.constant 1.000000e+00 : f32
    %65 = vector.broadcast %cst_18 : f32 to vector<2x8x1xf32>
    %66 = arith.subf %65, %62 : vector<2x8x1xf32>
    %67 = vector.broadcast %66 : vector<2x8x1xf32> to vector<2x8x128xf32>
    %68 = arith.mulf %67, %0 : vector<2x8x128xf32>
    %69 = arith.addf %64, %68 : vector<2x8x128xf32>
    %70 = arith.addf %69, %0 : vector<2x8x128xf32>
    %c0_19 = arith.constant 0 : index
    %c0_20 = arith.constant 0 : index
    %c0_21 = arith.constant 0 : index
    %71 = vector.load %arg5[%c0_19, %c0_20, %c0_21] : memref<2x8x128xf32, #tpu.memory_space<vmem>>, vector<2x8x128xf32>
    tpu.vector_store %arg5[%c0_19, %c0_20, %c0_21], %70 {strides = array<i32>} : memref<2x8x128xf32, #tpu.memory_space<vmem>>, vector<2x8x128xf32>,
    return
  }
}

module attributes {stable_mosaic.version = 11 : i64} {
  func.func @kernel(%arg0: memref<2x8x128xf32, #tpu.memory_space<vmem>>, %arg1: memref<2x8x128xf32, #tpu.memory_space<vmem>>, %arg2: memref<128x128xbf16, #tpu.memory_space<vmem>>, %arg3: memref<8x128xf32, #tpu.memory_space<vmem>>, %arg4: memref<2xf32, #tpu.memory_space<smem>>, %arg5: memref<2x1x8xf32, #tpu.memory_space<vmem>>, %arg6: memref<2x8x128xf32, #tpu.memory_space<vmem>>) attributes {dimension_semantics = [], scalar_prefetch = 0 : i64, scratch_operands = 0 : i64, tpu.core_type = #tpu.core_type<tc>} {
    %c0 = arith.constant 0 : index
    %c0_0 = arith.constant 0 : index
    %c0_1 = arith.constant 0 : index
    %0 = vector.load %arg0[%c0, %c0_0, %c0_1] : memref<2x8x128xf32, #tpu.memory_space<vmem>>, vector<2x8x128xf32>
    %c0_2 = arith.constant 0 : index
    %c0_3 = arith.constant 0 : index
    %c0_4 = arith.constant 0 : index
    %1 = vector.load %arg1[%c0_2, %c0_3, %c0_4] : memref<2x8x128xf32, #tpu.memory_space<vmem>>, vector<2x8x128xf32>
    %c0_5 = arith.constant 0 : index
    %c0_6 = arith.constant 0 : index
    %2 = vector.load %arg3[%c0_5, %c0_6] : memref<8x128xf32, #tpu.memory_space<vmem>>, vector<8x128xf32>
    %3 = vector.extract_strided_slice %2 {offsets = [0, 0], sizes = [1, 128], strides = [1, 1]} : vector<8x128xf32> to vector<1x128xf32>
    %4 = vector.extract_strided_slice %2 {offsets = [1, 0], sizes = [1, 128], strides = [1, 1]} : vector<8x128xf32> to vector<1x128xf32>
    %5 = vector.extract_strided_slice %2 {offsets = [2, 0], sizes = [1, 128], strides = [1, 1]} : vector<8x128xf32> to vector<1x128xf32>
    %6 = vector.extract_strided_slice %2 {offsets = [3, 0], sizes = [1, 128], strides = [1, 1]} : vector<8x128xf32> to vector<1x128xf32>
    %7 = vector.extract_strided_slice %2 {offsets = [4, 0], sizes = [1, 128], strides = [1, 1]} : vector<8x128xf32> to vector<1x128xf32>
    %c0_7 = arith.constant 0 : index
    %8 = memref.load %arg4[%c0_7] : memref<2xf32, #tpu.memory_space<smem>>
    %c1 = arith.constant 1 : index
    %9 = memref.load %arg4[%c1] : memref<2xf32, #tpu.memory_space<smem>>
    %10 = vector.shape_cast %1 : vector<2x8x128xf32> to vector<16x128xf32>
    %11 = arith.truncf %10 : vector<16x128xf32> to vector<16x128xbf16>
    %c0_8 = arith.constant 0 : index
    %c0_9 = arith.constant 0 : index
    %12 = vector.load %arg2[%c0_8, %c0_9] : memref<128x128xbf16, #tpu.memory_space<vmem>>, vector<128x128xbf16>
    %cst = arith.constant dense<0.000000e+00> : vector<16x128xf32>
    %13 = tpu.matmul %11, %12, %cst {dimension_numbers = #tpu.dot_dimension_numbers<[1], [0], [0], [1], [0, 0, 1, 1], [], []>} : vector<16x128xbf16>, vector<128x128xbf16>, vector<16x128xf32> -> vector<16x128xf32>
    %14 = vector.shape_cast %13 : vector<16x128xf32> to vector<2x8x128xf32>
    %15 = vector.shape_cast %4 : vector<1x128xf32> to vector<1x1x128xf32>
    %16 = vector.broadcast %15 : vector<1x1x128xf32> to vector<2x8x128xf32>
    %17 = arith.mulf %0, %16 : vector<2x8x128xf32>
    %cst_10 = arith.constant dense<0.000000e+00> : vector<2x8xf32>
    %18 = vector.multi_reduction <add>, %17, %cst_10 [2] : vector<2x8x128xf32> to vector<2x8xf32>
    %19 = vector.shape_cast %18 : vector<2x8xf32> to vector<2x8x1xf32>
    %20 = vector.shape_cast %3 : vector<1x128xf32> to vector<1x1x128xf32>
    %21 = vector.broadcast %20 : vector<1x1x128xf32> to vector<2x8x128xf32>
    %22 = arith.mulf %1, %21 : vector<2x8x128xf32>
    %cst_11 = arith.constant dense<0.000000e+00> : vector<2x8xf32>
    %23 = vector.multi_reduction <add>, %22, %cst_11 [2] : vector<2x8x128xf32> to vector<2x8xf32>
    %24 = vector.shape_cast %23 : vector<2x8xf32> to vector<2x1x8xf32>
    %25 = vector.broadcast %19 : vector<2x8x1xf32> to vector<2x8x8xf32>
    %26 = vector.broadcast %24 : vector<2x1x8xf32> to vector<2x8x8xf32>
    %27 = arith.addf %25, %26 : vector<2x8x8xf32>
    %28 = vector.broadcast %8 : f32 to vector<2x8x8xf32>
    %29 = arith.addf %27, %28 : vector<2x8x8xf32>
    %c0_12 = arith.constant 0 : index
    %c0_13 = arith.constant 0 : index
    %c0_14 = arith.constant 0 : index
    %30 = vector.load %arg5[%c0_12, %c0_13, %c0_14] : memref<2x1x8xf32, #tpu.memory_space<vmem>>, vector<2x1x8xf32>
    %31 = vector.broadcast %30 : vector<2x1x8xf32> to vector<2x8x8xf32>
    %32 = arith.addf %29, %31 : vector<2x8x8xf32>
    %cst_15 = arith.constant dense<0xFF800000> : vector<2x8xf32>
    %33 = vector.multi_reduction <maximumf>, %32, %cst_15 [2] : vector<2x8x8xf32> to vector<2x8xf32>
    %34 = vector.shape_cast %33 : vector<2x8xf32> to vector<2x8x1xf32>
    %35 = vector.broadcast %34 : vector<2x8x1xf32> to vector<2x8x8xf32>
    %36 = arith.subf %32, %35 : vector<2x8x8xf32>
    %37 = math.exp %36 : vector<2x8x8xf32>
    %cst_16 = arith.constant dense<0.000000e+00> : vector<2x8xf32>
    %38 = vector.multi_reduction <add>, %37, %cst_16 [2] : vector<2x8x8xf32> to vector<2x8xf32>
    %39 = vector.shape_cast %38 : vector<2x8xf32> to vector<2x8x1xf32>
    %40 = tpu.reciprocal %39 {approx = true} : vector<2x8x1xf32> -> vector<2x8x1xf32>
    %41 = vector.broadcast %40 : vector<2x8x1xf32> to vector<2x8x8xf32>
    %42 = arith.mulf %37, %41 : vector<2x8x8xf32>
    "tpu.trace_start"() <{level = 10 : i32, message = "bqk,bkh->bqh"}> : () -> ()
    %cst_17 = arith.constant dense<0.000000e+00> : vector<2x8x128xf32>
    %43 = tpu.matmul %42, %14, %cst_17 {dimension_numbers = #tpu.dot_dimension_numbers<[2], [1], [1], [2], [0, 0, 0, 1, 1, 2], [0], [0]>} : vector<2x8x8xf32>, vector<2x8x128xf32>, vector<2x8x128xf32> -> vector<2x8x128xf32>
    "tpu.trace_stop"() : () -> ()
    %44 = vector.shape_cast %7 : vector<1x128xf32> to vector<1x1x128xf32>
    %45 = vector.broadcast %44 : vector<1x1x128xf32> to vector<2x8x128xf32>
    %46 = arith.addf %43, %45 : vector<2x8x128xf32>
    %47 = arith.addf %46, %0 : vector<2x8x128xf32>
    %48 = vector.shape_cast %5 : vector<1x128xf32> to vector<1x1x128xf32>
    %49 = vector.broadcast %48 : vector<1x1x128xf32> to vector<2x8x128xf32>
    %50 = arith.mulf %47, %49 : vector<2x8x128xf32>
    %cst_18 = arith.constant dense<0.000000e+00> : vector<2x8xf32>
    %51 = vector.multi_reduction <add>, %50, %cst_18 [2] : vector<2x8x128xf32> to vector<2x8xf32>
    %52 = vector.shape_cast %51 : vector<2x8xf32> to vector<2x8x1xf32>
    %53 = vector.shape_cast %6 : vector<1x128xf32> to vector<1x1x128xf32>
    %54 = vector.broadcast %53 : vector<1x1x128xf32> to vector<2x8x128xf32>
    %55 = arith.mulf %0, %54 : vector<2x8x128xf32>
    %cst_19 = arith.constant dense<0.000000e+00> : vector<2x8xf32>
    %56 = vector.multi_reduction <add>, %55, %cst_19 [2] : vector<2x8x128xf32> to vector<2x8xf32>
    %57 = vector.shape_cast %56 : vector<2x8xf32> to vector<2x8x1xf32>
    %58 = arith.addf %52, %57 : vector<2x8x1xf32>
    %59 = vector.broadcast %9 : f32 to vector<2x8x1xf32>
    %60 = arith.addf %58, %59 : vector<2x8x1xf32>
    %61 = arith.negf %60 : vector<2x8x1xf32>
    %62 = math.exp %61 : vector<2x8x1xf32>
    %cst_20 = arith.constant 1.000000e+00 : f32
    %63 = vector.broadcast %cst_20 : f32 to vector<2x8x1xf32>
    %64 = arith.addf %63, %62 : vector<2x8x1xf32>
    %65 = arith.divf %63, %64 : vector<2x8x1xf32>
    %66 = vector.broadcast %65 : vector<2x8x1xf32> to vector<2x8x128xf32>
    %67 = arith.mulf %66, %47 : vector<2x8x128xf32>
    %cst_21 = arith.constant 1.000000e+00 : f32
    %68 = vector.broadcast %cst_21 : f32 to vector<2x8x1xf32>
    %69 = arith.subf %68, %65 : vector<2x8x1xf32>
    %70 = vector.broadcast %69 : vector<2x8x1xf32> to vector<2x8x128xf32>
    %71 = arith.mulf %70, %0 : vector<2x8x128xf32>
    %72 = arith.addf %67, %71 : vector<2x8x128xf32>
    %73 = arith.addf %72, %0 : vector<2x8x128xf32>
    %c0_22 = arith.constant 0 : index
    %c0_23 = arith.constant 0 : index
    %c0_24 = arith.constant 0 : index
    %74 = vector.load %arg6[%c0_22, %c0_23, %c0_24] : memref<2x8x128xf32, #tpu.memory_space<vmem>>, vector<2x8x128xf32>
    tpu.vector_store %arg6[%c0_22, %c0_23, %c0_24], %73 {strides = array<i32>} : memref<2x8x128xf32, #tpu.memory_space<vmem>>, vector<2x8x128xf32>,
    return
  }
}

module attributes {stable_mosaic.version = 11 : i64} {
  func.func @head_kernel(%arg0: memref<2x8x128xf32, #tpu.memory_space<vmem>>, %arg1: memref<2x256xf32, #tpu.memory_space<vmem>>, %arg2: memref<128x128xbf16, #tpu.memory_space<vmem>>, %arg3: memref<256x128xbf16, #tpu.memory_space<vmem>>, %arg4: memref<1x128xf32, #tpu.memory_space<vmem>>, %arg5: memref<1x128xf32, #tpu.memory_space<vmem>>, %arg6: memref<1xf32, #tpu.memory_space<smem>>, %arg7: memref<2x8xf32, #tpu.memory_space<vmem>>) attributes {dimension_semantics = [], scalar_prefetch = 0 : i64, scratch_operands = 0 : i64, tpu.core_type = #tpu.core_type<tc>} {
    %c0 = arith.constant 0 : index
    %c0_0 = arith.constant 0 : index
    %c0_1 = arith.constant 0 : index
    %0 = vector.load %arg0[%c0, %c0_0, %c0_1] : memref<2x8x128xf32, #tpu.memory_space<vmem>>, vector<2x8x128xf32>
    %1 = vector.shape_cast %0 : vector<2x8x128xf32> to vector<16x128xf32>
    %2 = arith.truncf %1 : vector<16x128xf32> to vector<16x128xbf16>
    %c0_2 = arith.constant 0 : index
    %c0_3 = arith.constant 0 : index
    %3 = vector.load %arg2[%c0_2, %c0_3] : memref<128x128xbf16, #tpu.memory_space<vmem>>, vector<128x128xbf16>
    %cst = arith.constant dense<0.000000e+00> : vector<16x128xf32>
    %4 = tpu.matmul %2, %3, %cst {dimension_numbers = #tpu.dot_dimension_numbers<[1], [0], [0], [1], [0, 0, 1, 1], [], []>} : vector<16x128xbf16>, vector<128x128xbf16>, vector<16x128xf32> -> vector<16x128xf32>
    %5 = vector.shape_cast %4 : vector<16x128xf32> to vector<2x8x128xf32>
    %c0_4 = arith.constant 0 : index
    %c0_5 = arith.constant 0 : index
    %6 = vector.load %arg1[%c0_4, %c0_5] : memref<2x256xf32, #tpu.memory_space<vmem>>, vector<2x256xf32>
    %7 = arith.truncf %6 : vector<2x256xf32> to vector<2x256xbf16>
    %c0_6 = arith.constant 0 : index
    %c0_7 = arith.constant 0 : index
    %8 = vector.load %arg3[%c0_6, %c0_7] : memref<256x128xbf16, #tpu.memory_space<vmem>>, vector<256x128xbf16>
    %cst_8 = arith.constant dense<0.000000e+00> : vector<2x128xf32>
    %9 = tpu.matmul %7, %8, %cst_8 {dimension_numbers = #tpu.dot_dimension_numbers<[1], [0], [0], [1], [0, 0, 1, 1], [], []>} : vector<2x256xbf16>, vector<256x128xbf16>, vector<2x128xf32> -> vector<2x128xf32>
    %10 = vector.shape_cast %9 : vector<2x128xf32> to vector<2x1x128xf32>
    %11 = vector.broadcast %10 : vector<2x1x128xf32> to vector<2x8x128xf32>
    %12 = arith.addf %5, %11 : vector<2x8x128xf32>
    %c0_9 = arith.constant 0 : index
    %c0_10 = arith.constant 0 : index
    %13 = vector.load %arg4[%c0_9, %c0_10] : memref<1x128xf32, #tpu.memory_space<vmem>>, vector<1x128xf32>
    %14 = vector.shape_cast %13 : vector<1x128xf32> to vector<1x1x128xf32>
    %15 = vector.broadcast %14 : vector<1x1x128xf32> to vector<2x8x128xf32>
    %16 = arith.addf %12, %15 : vector<2x8x128xf32>
    %17 = math.tanh %16 : vector<2x8x128xf32>
    %c0_11 = arith.constant 0 : index
    %c0_12 = arith.constant 0 : index
    %18 = vector.load %arg5[%c0_11, %c0_12] : memref<1x128xf32, #tpu.memory_space<vmem>>, vector<1x128xf32>
    %19 = vector.shape_cast %18 : vector<1x128xf32> to vector<1x1x128xf32>
    %20 = vector.broadcast %19 : vector<1x1x128xf32> to vector<2x8x128xf32>
    %21 = arith.mulf %17, %20 : vector<2x8x128xf32>
    %cst_13 = arith.constant dense<0.000000e+00> : vector<2x8xf32>
    %22 = vector.multi_reduction <add>, %21, %cst_13 [2] : vector<2x8x128xf32> to vector<2x8xf32>
    %c0_14 = arith.constant 0 : index
    %23 = memref.load %arg6[%c0_14] : memref<1xf32, #tpu.memory_space<smem>>
    %24 = vector.broadcast %23 : f32 to vector<2x8xf32>
    %25 = arith.addf %22, %24 : vector<2x8xf32>
    %26 = arith.negf %25 : vector<2x8xf32>
    %27 = math.exp %26 : vector<2x8xf32>
    %cst_15 = arith.constant 1.000000e+00 : f32
    %28 = vector.broadcast %cst_15 : f32 to vector<2x8xf32>
    %29 = arith.addf %28, %27 : vector<2x8xf32>
    %30 = arith.divf %28, %29 : vector<2x8xf32>
    %c0_16 = arith.constant 0 : index
    %c0_17 = arith.constant 0 : index
    %31 = vector.load %arg7[%c0_16, %c0_17] : memref<2x8xf32, #tpu.memory_space<vmem>>, vector<2x8xf32>
    tpu.vector_store %arg7[%c0_16, %c0_17], %30 {strides = array<i32>} : memref<2x8xf32, #tpu.memory_space<vmem>>, vector<2x8xf32>,
    return
  }
}

</mosaic_0001>

<bundles_post_ra>
// kernel: hgat_forward.5
= control target key start
LH: loop header
LB: loop body
LE: loop exit
PB: predicated region body
PF: predicated region fallthrough
CT: control target
= control target key end

     0   :  { %10 = vsyncpa [#allocation3], 0  ;;  %s386_s21 = smov [#allocation2]   ;;  %s496_s0 = inlined_call_operand.vmem [shape: f32[2,8,128], index: 0, kind: input, shape index: {}]   ;;  %s497_s1 = inlined_call_operand.vmem [shape: f32[2,8,128], index: 1, kind: input, shape index: {}]   ;;  %s498_s2 = inlined_call_operand.vmem [shape: bf16[128,128], index: 2, kind: input, shape index: {}]   ;;  %s499_s3 = inlined_call_operand.vmem [shape: f32[8,128], index: 3, kind: input, shape index: {}]   ;;  %s500_s4 = inlined_call_operand.vmem [shape: f32[2], index: 4, kind: input, shape index: {}]   ;;  %s501_s5 = inlined_call_operand.vmem [shape: f32[2,8,128], index: 5, kind: output, shape index: {}]  }
   0x1   :  { %s24_s20 = sshll.u32 %s500_s4, 4  ;;  %s25_s20 = int_to_ptr.vmem [resolvable:$true] %s24_s20 }
   0x2   :  { %27 = dma.vmem_to_smem %s25_s20, 16, %s386_s21, [#allocation3]  }
   0x3   :  { %384 = dma.done.wait [#allocation3], 16  }
   0x4   :  { %385 = vsyncadd [#allocation3], 4294967280 }
   0x5   :  { %32 = sfence }
   0x6   :  { %v36_v0 = vld [vmem:[%s497_s1 + $0x8] sm:$0xff]  ;;  %v426_v1 = vld [vmem:[%s499_s3] sm:$0xff]  ;;  %v354_v11 = vld [vmem:[%s498_s2 + $0x38] sm:$0xff]  ;;  %v135_v14 = vlaneseq  ;;  %vm164_vm0 = vcmask 64512  }
   0x7   :  { %v35_v2 = vld [vmem:[%s497_s1] sm:$0xff]  ;;  %v126_v3 = vperm.slane %v426_v1, 0  ;;  %v119_v6 = vperm.slane %v426_v1, 1  ;;  %v436_v7 = vld [vmem:[%s496_s0 + $0x8] sm:$0xff]  ;;  %105 = vmatpush.bf16.msra.mxu0 %v354_v11  ;;  %v353_v12 = vld [vmem:[%s498_s2 + $0x30] sm:$0xff]  ;;  %v243_v53 = vperm.slane %v426_v1, 3 }
   0x8   :  { %v441_v8 = vld [vmem:[%s496_s0] sm:$0xff]  ;;  %v352_v13 = vld [vmem:[%s498_s2 + $0x28] sm:$0xff]  ;;  %s38_s0 = sld [smem:[#allocation2]]  ;;  %v136_v18 = vand.u32 127, %v135_v14  ;;  %v350_v19 = vld [vmem:[%s498_s2 + $0x18] sm:$0xff]  ;;  %v40_v34 = vpack.c.bf16 %v36_v0, %v35_v2  ;;  %v187_v55 = vperm.slane %v426_v1, 4 }
   0x9   :  { %v128_v4 = vmul.f32 %v126_v3, %v36_v0  ;;  %v127_v5 = vmul.f32 %v126_v3, %v35_v2  ;;  %v121_v9 = vmul.f32 %v119_v6, %v436_v7  ;;  %v120_v10 = vmul.f32 %v119_v6, %v441_v8  ;;  %v351_v17 = vld [vmem:[%s498_s2 + $0x20] sm:$0xff]  ;;  %v349_v23 = vld [vmem:[%s498_s2 + $0x10] sm:$0xff]  ;;  %v348_v28 = vld [vmem:[%s498_s2 + $0x8] sm:$0xff] }
   0xa   :  { %v347_v31 = vld [vmem:[%s498_s2] sm:$0xff]  ;;  %v244_v54 = vmul.f32 %v243_v53, %v441_v8  ;;  %v236_v58 = vperm.slane %v426_v1, 2  ;;  %v245_v2 = vmul.f32 %v243_v53, %v436_v7  ;;  %s310_s2 = sld [smem:[#allocation2 + $0x1]] }
   0xb   :  { %131 = vadd.xlane.f32.xlu0 %v128_v4  ;;  %129 = vadd.xlane.f32.xlu1 %v127_v5 }
   0xc   :  { %106 = vmatpush.bf16.msra.mxu0 %v353_v12 }
   0xe   :  { %v161_v22 = vstv %s38_s0 }
  0x10   :  { %107 = vmatpush.bf16.msra.mxu0 %v352_v13  ;;  %v252_v5 = vstv %s310_s2 }
  0x13   :  { %124 = vadd.xlane.f32.xlu0 %v121_v9  ;;  %122 = vadd.xlane.f32.xlu1 %v120_v10 }
  0x14   :  { %108 = vmatpush.bf16.msra.mxu0 %v351_v17 }
  0x18   :  { %109 = vmatpush.bf16.msra.mxu0 %v350_v19 }
  0x1c   :  { %110 = vmatpush.bf16.msra.mxu0 %v349_v23 }
  0x20   :  { %111 = vmatpush.bf16.msra.mxu0 %v348_v28 }
  0x24   :  { %112 = vmatpush.bf16.msra.mxu0 %v347_v31 }
  0x27   :  { %113 = vmatmul.bf16.vlgmr.msra.gmra.mxu0 %v40_v34 }
  0x7e   :  { %v132_v15 = vpop.xlane.xlu0 %131  ;;  %v130_v16 = vpop.xlane.xlu1 %129 }
  0x7f   :  { %v138_v20 = vperm.slane %v132_v15, %v136_v18  ;;  %v137_v24 = vperm.slane %v130_v16, %v136_v18 }
  0x86   :  { %v125_v21 = vpop.xlane.xlu0 %124  ;;  %v123_v26 = vpop.xlane.xlu1 %122 }
  0x87   :  { %v160_v25 = vadd.f32 %v138_v20, %v125_v21  ;;  %v159_v29 = vadd.f32 %v137_v24, %v123_v26 }
  0x89   :  { %v163_v27 = vadd.f32 %v161_v22, %v160_v25  ;;  %v162_v32 = vadd.f32 %v161_v22, %v159_v29 }
  0x8b   :  { %v168_v30 = vsel %vm164_vm0, %v163_v27, -inf  ;;  %v165_v33 = vsel %vm164_vm0, %v162_v32, -inf }
  0x8c   :  { %169 = vmax.xlane.f32.xlu2 %v168_v30 }
  0x94   :  { %166 = vmax.xlane.f32.xlu2 %v165_v33 }
  0xa4   :  { %v114_v45 = vpop.f32.mrf.mxu0 }
  0xa5   :  { %206 = vmatpush.msra.mxu1 %v114_v45 }
  0xac   :  { %v116_v46 = vpop.f32.mrf.mxu0 }
  0xad   :  { %229 = vmatpush.msra.mxu2 %v116_v46 }
  0xff   :  { %v170_v35 = vpop.xlane.xlu2 %169 }
 0x100   :  { %v172_v36 = vsub.f32 %v163_v27, %v170_v35 }
 0x102   :  { %v175_v37 = vmul.f32 1.442695, %v172_v36 }
 0x104   :  { %356 = vpow2.f32 %v175_v37 }
 0x107   :  { %v167_v38 = vpop.xlane.xlu2 %166 }
 0x108   :  { %v171_v39 = vsub.f32 %v162_v32, %v167_v38 }
 0x10a   :  { %v357_v40 = vpop.eup %356  ;;  %v173_v41 = vmul.f32 1.442695, %v171_v39 }
 0x10b   :  { %v180_v42 = vsel %vm164_vm0, %v357_v40, 0.0 }
 0x10c   :  { %358 = vpow2.f32 %v173_v41  ;;  %181 = vadd.xlane.f32.xlu0 %v180_v42 }
 0x112   :  { %v359_v43 = vpop.eup %358 }
 0x113   :  { %v177_v44 = vsel %vm164_vm0, %v359_v43, 0.0 }
 0x114   :  { %178 = vadd.xlane.f32.xlu1 %v177_v44 }
 0x11c   :  { %246 = vadd.xlane.f32.xlu1 %v244_v54 }
 0x17f   :  { %v182_v47 = vpop.xlane.xlu0 %181 }
 0x180   :  { %360 = vrcp.f32 %v182_v47 }
 0x186   :  { %v361_v48 = vpop.eup %360 }
 0x187   :  { %v179_v49 = vpop.xlane.xlu1 %178  ;;  %v186_v50 = vmul.f32 %v361_v48, %v357_v40 }
 0x188   :  { %362 = vrcp.f32 %v179_v49 }
 0x189   :  { %344 = vmatmul.msk.f32.vlgmr.msra.gmra.mxu2 %vm164_vm0, %v186_v50 }
 0x18e   :  { %v363_v51 = vpop.eup %362 }
 0x18f   :  { %v185_v52 = vmul.f32 %v363_v51, %v359_v43  ;;  %v247_v3 = vpop.xlane.xlu1 %246 }
 0x191   :  { %343 = vmatmul.msk.f32.vlgmr.msra.gmra.mxu1 %vm164_vm0, %v185_v52 }
 0x20c   :  { %v231_v56 = vpop.f32.mrf.mxu2 }
 0x20d   :  { %v232_v57 = vadd.f32 %v231_v56, %v187_v55 }
 0x20e   :  { %v208_v59 = vpop.f32.mrf.mxu1 }
 0x20f   :  { %v480_v60 = vadd.f32 %v232_v57, %v436_v7  ;;  %v209_v61 = vadd.f32 %v208_v59, %v187_v55 }
 0x211   :  { %v234_v62 = vadd.f32 %v209_v61, %v441_v8  ;;  %v238_v63 = vmul.f32 %v236_v58, %v480_v60 }
 0x213   :  { %241 = vadd.xlane.f32.xlu0 %v238_v63  ;;  %v237_v0 = vmul.f32 %v236_v58, %v234_v62 }
 0x215   :  { %239 = vadd.xlane.f32.xlu2 %v237_v0 }
 0x21d   :  { %248 = vadd.xlane.f32.xlu2 %v245_v2 }
 0x286   :  { %v242_v10 = vpop.xlane.xlu0 %241 }
 0x288   :  { %v240_v4 = vpop.xlane.xlu2 %239 }
 0x289   :  { %v250_v1 = vadd.f32 %v247_v3, %v240_v4 }
 0x28b   :  { %v253_v6 = vadd.f32 %v252_v5, %v250_v1 }
 0x28d   :  { %v345_v9 = vmul.f32 -1.442695, %v253_v6 }
 0x28f   :  { %364 = vpow2.f32 %v345_v9 }
 0x290   :  { %v249_v11 = vpop.xlane.xlu2 %248 }
 0x291   :  { %v251_v12 = vadd.f32 %v249_v11, %v242_v10 }
 0x293   :  { %v254_v13 = vadd.f32 %v252_v5, %v251_v12 }
 0x295   :  { %v365_v14 = vpop.eup %364  ;;  %v346_v15 = vmul.f32 -1.442695, %v254_v13 }
 0x296   :  { %v261_v16 = vadd.f32 1.0, %v365_v14 }
 0x297   :  { %366 = vpow2.f32 %v346_v15 }
 0x298   :  { %368 = vrcp.f32 %v261_v16  ;;  %v274_v22 = vand.u32 2147483648, %v261_v16  ;;  %v272_v24 = vand.u32 2147483647, %v261_v16  ;;  %vm268_vm2 = vweird.f32 %v261_v16 }
 0x29a   :  { %v275_v27 = vor.u32 1.1754944e-38, %v274_v22  ;;  %vm273_vm4 = vcmp.eq.f32.partialorder %v272_v24, 8.507059e+37 }
 0x29d   :  { %v367_v17 = vpop.eup %366 }
 0x29e   :  { %v369_v18 = vpop.eup %368  ;;  %v262_v19 = vadd.f32 1.0, %v367_v17 }
 0x29f   :  { %v264_v20 = vmul.f32 %v369_v18, %v261_v16  ;;  %vm269_vm1 = vweird.f32 %v369_v18 }
 0x2a0   :  { %370 = vrcp.f32 %v262_v19  ;;  %vm270_vm3 = vmor %vm268_vm2, %vm269_vm1  ;;  %v287_v33 = vand.u32 2147483647, %v262_v19  ;;  %v289_v34 = vand.u32 2147483648, %v262_v19  ;;  %vm283_vm6 = vweird.f32 %v262_v19 }
 0x2a1   :  { %v265_v21 = vsub.f32 1.0, %v264_v20 }
 0x2a2   :  { %v290_v40 = vor.u32 1.1754944e-38, %v289_v34  ;;  %vm288_vm8 = vcmp.eq.f32.partialorder %v287_v33, 8.507059e+37 }
 0x2a3   :  { %v266_v23 = vmul.f32 %v369_v18, %v265_v21 }
 0x2a5   :  { %v267_v25 = vadd.f32 %v369_v18, %v266_v23 }
 0x2a6   :  { %v371_v26 = vpop.eup %370 }
 0x2a7   :  { %v271_v28 = vsel %vm270_vm3, %v369_v18, %v267_v25  ;;  %v279_v29 = vmul.f32 %v371_v26, %v262_v19  ;;  %vm284_vm5 = vweird.f32 %v371_v26 }
 0x2a8   :  { %v276_v30 = vsel %vm273_vm4, %v275_v27, %v271_v28  ;;  %vm285_vm7 = vmor %vm283_vm6, %vm284_vm5 }
 0x2a9   :  { %v295_v31 = vsub.f32 1.0, %v276_v30  ;;  %v280_v32 = vsub.f32 1.0, %v279_v29  ;;  %v293_v35 = vmul.f32 %v276_v30, %v234_v62 }
 0x2ab   :  { %v297_v36 = vmul.f32 %v295_v31, %v441_v8  ;;  %v281_v37 = vmul.f32 %v371_v26, %v280_v32 }
 0x2ad   :  { %v299_v38 = vadd.f32 %v297_v36, %v293_v35  ;;  %v282_v39 = vadd.f32 %v371_v26, %v281_v37 }
 0x2af   :  { %v301_v41 = vadd.f32 %v299_v38, %v441_v8  ;;  %v286_v42 = vsel %vm285_vm7, %v371_v26, %v282_v39 }
 0x2b0   :  { %v291_v43 = vsel %vm288_vm8, %v290_v40, %v286_v42 }
 0x2b1   :  { %303 = vst [vmem:[%s501_s5] sm:$0xff] %v301_v41  ;;  %v296_v44 = vsub.f32 1.0, %v291_v43  ;;  %v294_v45 = vmul.f32 %v291_v43, %v480_v60 }
 0x2b3   :  { %v298_v46 = vmul.f32 %v296_v44, %v436_v7 }
 0x2b5   :  { %v300_v47 = vadd.f32 %v298_v46, %v294_v45 }
 0x2b7   :  { %v302_v48 = vadd.f32 %v300_v47, %v436_v7 }
 0x2b9   :  { %304 = vst [vmem:[%s501_s5 + $0x8] sm:$0xff] %v302_v48 }
 0x2ba   :  { %309 = vsyncpa [#allocation3], 1 }

// kernel: hgat_forward.6
= control target key start
LH: loop header
LB: loop body
LE: loop exit
PB: predicated region body
PF: predicated region fallthrough
CT: control target
= control target key end

     0   :  { %11 = vsyncpa [#allocation3], 0  ;;  %s401_s24 = smov [#allocation2]   ;;  %s522_s0 = inlined_call_operand.vmem [shape: f32[2,8,128], index: 0, kind: input, shape index: {}]   ;;  %s523_s1 = inlined_call_operand.vmem [shape: f32[2,8,128], index: 1, kind: input, shape index: {}]   ;;  %s524_s2 = inlined_call_operand.vmem [shape: bf16[128,128], index: 2, kind: input, shape index: {}]   ;;  %s525_s3 = inlined_call_operand.vmem [shape: f32[8,128], index: 3, kind: input, shape index: {}]   ;;  %s526_s4 = inlined_call_operand.vmem [shape: f32[2], index: 4, kind: input, shape index: {}]   ;;  %s527_s5 = inlined_call_operand.vmem [shape: f32[2,1,8], index: 5, kind: input, shape index: {}]   ;;  %s528_s6 = inlined_call_operand.vmem [shape: f32[2,8,128], index: 6, kind: output, shape index: {}]  }
   0x1   :  { %s25_s23 = sshll.u32 %s526_s4, 4  ;;  %s26_s23 = int_to_ptr.vmem [resolvable:$true] %s25_s23 }
   0x2   :  { %28 = dma.vmem_to_smem %s26_s23, 16, %s401_s24, [#allocation3]  }
   0x3   :  { %399 = dma.done.wait [#allocation3], 16  }
   0x4   :  { %400 = vsyncadd [#allocation3], 4294967280 }
   0x5   :  { %35 = sfence }
   0x6   :  { %v39_v0 = vld [vmem:[%s523_s1 + $0x8] sm:$0xff]  ;;  %v446_v1 = vld [vmem:[%s525_s3] sm:$0xff]  ;;  %v367_v11 = vld [vmem:[%s524_s2 + $0x38] sm:$0xff]  ;;  %v138_v14 = vlaneseq  ;;  %vm177_vm0 = vcmask 64512  }
   0x7   :  { %v38_v2 = vld [vmem:[%s523_s1] sm:$0xff]  ;;  %v129_v3 = vperm.slane %v446_v1, 0  ;;  %v122_v6 = vperm.slane %v446_v1, 1  ;;  %v456_v7 = vld [vmem:[%s522_s0 + $0x8] sm:$0xff]  ;;  %108 = vmatpush.bf16.msra.mxu0 %v367_v11  ;;  %v366_v12 = vld [vmem:[%s524_s2 + $0x30] sm:$0xff]  ;;  %v256_v57 = vperm.slane %v446_v1, 3 }
   0x8   :  { %v461_v8 = vld [vmem:[%s522_s0] sm:$0xff]  ;;  %v365_v13 = vld [vmem:[%s524_s2 + $0x28] sm:$0xff]  ;;  %s41_s0 = sld [smem:[#allocation2]]  ;;  %v139_v18 = vand.u32 127, %v138_v14  ;;  %v363_v19 = vld [vmem:[%s524_s2 + $0x18] sm:$0xff]  ;;  %v43_v38 = vpack.c.bf16 %v39_v0, %v38_v2  ;;  %v200_v59 = vperm.slane %v446_v1, 4 }
   0x9   :  { %v131_v4 = vmul.f32 %v129_v3, %v39_v0  ;;  %v130_v5 = vmul.f32 %v129_v3, %v38_v2  ;;  %v124_v9 = vmul.f32 %v122_v6, %v456_v7  ;;  %v123_v10 = vmul.f32 %v122_v6, %v461_v8  ;;  %v364_v17 = vld [vmem:[%s524_s2 + $0x20] sm:$0xff]  ;;  %v362_v27 = vld [vmem:[%s524_s2 + $0x10] sm:$0xff]  ;;  %v361_v31 = vld [vmem:[%s524_s2 + $0x8] sm:$0xff] }
   0xa   :  { %v369_v26 = vld [vmem:[%s527_s5 + $0x1] ss:$0 sm:$0xff]  ;;  %v370_v34 = vld [vmem:[%s527_s5] ss:$0 sm:$0xff]  ;;  %v257_v58 = vmul.f32 %v256_v57, %v461_v8  ;;  %v249_v62 = vperm.slane %v446_v1, 2  ;;  %v258_v6 = vmul.f32 %v256_v57, %v456_v7 }
   0xb   :  { %134 = vadd.xlane.f32.xlu0 %v131_v4  ;;  %132 = vadd.xlane.f32.xlu1 %v130_v5  ;;  %v360_v35 = vld [vmem:[%s524_s2] sm:$0xff]  ;;  %s323_s2 = sld [smem:[#allocation2 + $0x1]] }
   0xc   :  { %109 = vmatpush.bf16.msra.mxu0 %v366_v12 }
   0xe   :  { %v164_v22 = vstv %s41_s0 }
  0x10   :  { %110 = vmatpush.bf16.msra.mxu0 %v365_v13 }
  0x11   :  { %v265_v11 = vstv %s323_s2 }
  0x13   :  { %127 = vadd.xlane.f32.xlu0 %v124_v9  ;;  %125 = vadd.xlane.f32.xlu1 %v123_v10 }
  0x14   :  { %111 = vmatpush.bf16.msra.mxu0 %v364_v17 }
  0x18   :  { %112 = vmatpush.bf16.msra.mxu0 %v363_v19 }
  0x1c   :  { %113 = vmatpush.bf16.msra.mxu0 %v362_v27 }
  0x20   :  { %114 = vmatpush.bf16.msra.mxu0 %v361_v31 }
  0x24   :  { %115 = vmatpush.bf16.msra.mxu0 %v360_v35 }
  0x27   :  { %116 = vmatmul.bf16.vlgmr.msra.gmra.mxu0 %v43_v38 }
  0x7e   :  { %v135_v15 = vpop.xlane.xlu0 %134  ;;  %v133_v16 = vpop.xlane.xlu1 %132 }
  0x7f   :  { %v141_v20 = vperm.slane %v135_v15, %v139_v18  ;;  %v140_v21 = vperm.slane %v133_v16, %v139_v18 }
  0x86   :  { %v128_v23 = vpop.xlane.xlu0 %127  ;;  %v126_v24 = vpop.xlane.xlu1 %125 }
  0x87   :  { %v163_v25 = vadd.f32 %v141_v20, %v128_v23  ;;  %v162_v29 = vadd.f32 %v140_v21, %v126_v24 }
  0x89   :  { %v166_v28 = vadd.f32 %v164_v22, %v163_v25  ;;  %v165_v32 = vadd.f32 %v164_v22, %v162_v29 }
  0x8b   :  { %v176_v30 = vadd.f32 %v369_v26, %v166_v28  ;;  %v175_v36 = vadd.f32 %v370_v34, %v165_v32 }
  0x8d   :  { %v181_v33 = vsel %vm177_vm0, %v176_v30, -inf  ;;  %v178_v37 = vsel %vm177_vm0, %v175_v36, -inf }
  0x8e   :  { %182 = vmax.xlane.f32.xlu2 %v181_v33 }
  0x96   :  { %179 = vmax.xlane.f32.xlu2 %v178_v37 }
  0xa4   :  { %v117_v49 = vpop.f32.mrf.mxu0 }
  0xa5   :  { %219 = vmatpush.msra.mxu1 %v117_v49 }
  0xac   :  { %v119_v50 = vpop.f32.mrf.mxu0 }
  0xad   :  { %242 = vmatpush.msra.mxu2 %v119_v50 }
 0x101   :  { %v183_v39 = vpop.xlane.xlu2 %182 }
 0x102   :  { %v185_v40 = vsub.f32 %v176_v30, %v183_v39 }
 0x104   :  { %v188_v41 = vmul.f32 1.442695, %v185_v40 }
 0x106   :  { %371 = vpow2.f32 %v188_v41 }
 0x109   :  { %v180_v42 = vpop.xlane.xlu2 %179 }
 0x10a   :  { %v184_v43 = vsub.f32 %v175_v36, %v180_v42 }
 0x10c   :  { %v372_v44 = vpop.eup %371  ;;  %v186_v45 = vmul.f32 1.442695, %v184_v43 }
 0x10d   :  { %v193_v46 = vsel %vm177_vm0, %v372_v44, 0.0 }
 0x10e   :  { %373 = vpow2.f32 %v186_v45  ;;  %194 = vadd.xlane.f32.xlu0 %v193_v46 }
 0x114   :  { %v374_v47 = vpop.eup %373 }
 0x115   :  { %v190_v48 = vsel %vm177_vm0, %v374_v47, 0.0 }
 0x116   :  { %191 = vadd.xlane.f32.xlu1 %v190_v48 }
 0x11e   :  { %259 = vadd.xlane.f32.xlu1 %v257_v58 }
 0x181   :  { %v195_v51 = vpop.xlane.xlu0 %194 }
 0x182   :  { %375 = vrcp.f32 %v195_v51 }
 0x188   :  { %v376_v52 = vpop.eup %375 }
 0x189   :  { %v192_v53 = vpop.xlane.xlu1 %191  ;;  %v199_v54 = vmul.f32 %v376_v52, %v372_v44 }
 0x18a   :  { %377 = vrcp.f32 %v192_v53 }
 0x18b   :  { %357 = vmatmul.msk.f32.vlgmr.msra.gmra.mxu2 %vm177_vm0, %v199_v54 }
 0x190   :  { %v378_v55 = vpop.eup %377 }
 0x191   :  { %v198_v56 = vmul.f32 %v378_v55, %v374_v47  ;;  %v260_v9 = vpop.xlane.xlu1 %259 }
 0x193   :  { %356 = vmatmul.msk.f32.vlgmr.msra.gmra.mxu1 %vm177_vm0, %v198_v56 }
 0x20e   :  { %v244_v60 = vpop.f32.mrf.mxu2 }
 0x20f   :  { %v245_v61 = vadd.f32 %v244_v60, %v200_v59 }
 0x210   :  { %v221_v63 = vpop.f32.mrf.mxu1 }
 0x211   :  { %v506_v0 = vadd.f32 %v245_v61, %v456_v7  ;;  %v222_v2 = vadd.f32 %v221_v63, %v200_v59 }
 0x213   :  { %v247_v3 = vadd.f32 %v222_v2, %v461_v8  ;;  %v251_v4 = vmul.f32 %v249_v62, %v506_v0 }
 0x215   :  { %254 = vadd.xlane.f32.xlu0 %v251_v4  ;;  %v250_v5 = vmul.f32 %v249_v62, %v247_v3 }
 0x217   :  { %252 = vadd.xlane.f32.xlu2 %v250_v5 }
 0x21f   :  { %261 = vadd.xlane.f32.xlu2 %v258_v6 }
 0x288   :  { %v255_v14 = vpop.xlane.xlu0 %254 }
 0x28a   :  { %v253_v10 = vpop.xlane.xlu2 %252 }
 0x28b   :  { %v263_v1 = vadd.f32 %v260_v9, %v253_v10 }
 0x28d   :  { %v266_v12 = vadd.f32 %v265_v11, %v263_v1 }
 0x28f   :  { %v358_v13 = vmul.f32 -1.442695, %v266_v12 }
 0x291   :  { %379 = vpow2.f32 %v358_v13 }
 0x292   :  { %v262_v15 = vpop.xlane.xlu2 %261 }
 0x293   :  { %v264_v16 = vadd.f32 %v262_v15, %v255_v14 }
 0x295   :  { %v267_v17 = vadd.f32 %v265_v11, %v264_v16 }
 0x297   :  { %v380_v18 = vpop.eup %379  ;;  %v359_v19 = vmul.f32 -1.442695, %v267_v17 }
 0x298   :  { %v274_v20 = vadd.f32 1.0, %v380_v18 }
 0x299   :  { %381 = vpow2.f32 %v359_v19 }
 0x29a   :  { %383 = vrcp.f32 %v274_v20  ;;  %v287_v26 = vand.u32 2147483648, %v274_v20  ;;  %v285_v28 = vand.u32 2147483647, %v274_v20  ;;  %vm281_vm2 = vweird.f32 %v274_v20 }
 0x29c   :  { %v288_v31 = vor.u32 1.1754944e-38, %v287_v26  ;;  %vm286_vm4 = vcmp.eq.f32.partialorder %v285_v28, 8.507059e+37 }
 0x29f   :  { %v382_v21 = vpop.eup %381 }
 0x2a0   :  { %v384_v22 = vpop.eup %383  ;;  %v275_v23 = vadd.f32 1.0, %v382_v21 }
 0x2a1   :  { %v277_v24 = vmul.f32 %v384_v22, %v274_v20  ;;  %vm282_vm1 = vweird.f32 %v384_v22 }
 0x2a2   :  { %385 = vrcp.f32 %v275_v23  ;;  %vm283_vm3 = vmor %vm281_vm2, %vm282_vm1  ;;  %v300_v37 = vand.u32 2147483647, %v275_v23  ;;  %v302_v38 = vand.u32 2147483648, %v275_v23  ;;  %vm296_vm6 = vweird.f32 %v275_v23 }
 0x2a3   :  { %v278_v25 = vsub.f32 1.0, %v277_v24 }
 0x2a4   :  { %v303_v44 = vor.u32 1.1754944e-38, %v302_v38  ;;  %vm301_vm8 = vcmp.eq.f32.partialorder %v300_v37, 8.507059e+37 }
 0x2a5   :  { %v279_v27 = vmul.f32 %v384_v22, %v278_v25 }
 0x2a7   :  { %v280_v29 = vadd.f32 %v384_v22, %v279_v27 }
 0x2a8   :  { %v386_v30 = vpop.eup %385 }
 0x2a9   :  { %v284_v32 = vsel %vm283_vm3, %v384_v22, %v280_v29  ;;  %v292_v33 = vmul.f32 %v386_v30, %v275_v23  ;;  %vm297_vm5 = vweird.f32 %v386_v30 }
 0x2aa   :  { %v289_v34 = vsel %vm286_vm4, %v288_v31, %v284_v32  ;;  %vm298_vm7 = vmor %vm296_vm6, %vm297_vm5 }
 0x2ab   :  { %v308_v35 = vsub.f32 1.0, %v289_v34  ;;  %v293_v36 = vsub.f32 1.0, %v292_v33  ;;  %v306_v39 = vmul.f32 %v289_v34, %v247_v3 }
 0x2ad   :  { %v310_v40 = vmul.f32 %v308_v35, %v461_v8  ;;  %v294_v41 = vmul.f32 %v386_v30, %v293_v36 }
 0x2af   :  { %v312_v42 = vadd.f32 %v310_v40, %v306_v39  ;;  %v295_v43 = vadd.f32 %v386_v30, %v294_v41 }
 0x2b1   :  { %v314_v45 = vadd.f32 %v312_v42, %v461_v8  ;;  %v299_v46 = vsel %vm298_vm7, %v386_v30, %v295_v43 }
 0x2b2   :  { %v304_v47 = vsel %vm301_vm8, %v303_v44, %v299_v46 }
 0x2b3   :  { %316 = vst [vmem:[%s528_s6] sm:$0xff] %v314_v45  ;;  %v309_v48 = vsub.f32 1.0, %v304_v47  ;;  %v307_v49 = vmul.f32 %v304_v47, %v506_v0 }
 0x2b5   :  { %v311_v50 = vmul.f32 %v309_v48, %v456_v7 }
 0x2b7   :  { %v313_v51 = vadd.f32 %v311_v50, %v307_v49 }
 0x2b9   :  { %v315_v52 = vadd.f32 %v313_v51, %v456_v7 }
 0x2bb   :  { %317 = vst [vmem:[%s528_s6 + $0x8] sm:$0xff] %v315_v52 }
 0x2bc   :  { %322 = vsyncpa [#allocation3], 1 }

// kernel: hgat_forward.9
= control target key start
LH: loop header
LB: loop body
LE: loop exit
PB: predicated region body
PF: predicated region fallthrough
CT: control target
= control target key end

     0   :  { %s664_s0 = inlined_call_operand.vmem [shape: f32[2,8,128], index: 0, kind: input, shape index: {}]   ;;  %s665_s1 = inlined_call_operand.vmem [shape: f32[2,256], index: 1, kind: input, shape index: {}]   ;;  %s666_s2 = inlined_call_operand.vmem [shape: bf16[128,128], index: 2, kind: input, shape index: {}]   ;;  %s667_s3 = inlined_call_operand.vmem [shape: bf16[256,128], index: 3, kind: input, shape index: {}]   ;;  %s668_s4 = inlined_call_operand.vmem [shape: f32[1,128], index: 4, kind: input, shape index: {}]   ;;  %s669_s5 = inlined_call_operand.vmem [shape: f32[1,128], index: 5, kind: input, shape index: {}]   ;;  %s670_s6 = inlined_call_operand.<no memory space> [shape: f32[1], index: 6, kind: input, shape index: {}]   ;;  %s671_s7 = inlined_call_operand.hbm [shape: f32[2,8], index: 7, kind: output, shape index: {}]  }
   0x1   :  { %v480_v0 = vld [vmem:[%s667_s3 + $0x38] sm:$0xff]  ;;  %v479_v3 = vld [vmem:[%s667_s3 + $0x30] sm:$0xff]  ;;  %v478_v6 = vld [vmem:[%s667_s3 + $0x28] sm:$0xff] }
   0x2   :  { %v488_v1 = vld [vmem:[%s667_s3 + $0x78] sm:$0xff]  ;;  %246 = vmatpush.bf16.msra.mxu1 %v480_v0  ;;  %v487_v4 = vld [vmem:[%s667_s3 + $0x70] sm:$0xff]  ;;  %v486_v7 = vld [vmem:[%s667_s3 + $0x68] sm:$0xff] }
   0x3   :  { %v472_v2 = vld [vmem:[%s666_s2 + $0x38] sm:$0xff]  ;;  %259 = vmatpush.bf16.msra.mxu2 %v488_v1  ;;  %v471_v5 = vld [vmem:[%s666_s2 + $0x30] sm:$0xff]  ;;  %v470_v8 = vld [vmem:[%s666_s2 + $0x28] sm:$0xff] }
   0x4   :  { %95 = vmatpush.bf16.msra.mxu0 %v472_v2  ;;  %v109_v9 = vld [vmem:[%s665_s1] sm:$0xf] }
   0x5   :  { %111 = vst [vmem:[#allocation1] ss:$4 sm:$0xff] %v109_v9  ;;  %v477_v10 = vld [vmem:[%s667_s3 + $0x20] sm:$0xff] }
   0x6   :  { %247 = vmatpush.bf16.msra.mxu1 %v479_v3  ;;  %v485_v11 = vld [vmem:[%s667_s3 + $0x60] sm:$0xff] }
   0x7   :  { %260 = vmatpush.bf16.msra.mxu2 %v487_v4 }
   0x8   :  { %96 = vmatpush.bf16.msra.mxu0 %v471_v5 }
   0xa   :  { %248 = vmatpush.bf16.msra.mxu1 %v478_v6 }
   0xb   :  { %261 = vmatpush.bf16.msra.mxu2 %v486_v7 }
   0xc   :  { %13 = vsyncpa [#allocation4], 0  ;;  %97 = vmatpush.bf16.msra.mxu0 %v470_v8  ;;  %v469_v12 = vld [vmem:[%s666_s2 + $0x20] sm:$0xff]  ;;  %v476_v13 = vld [vmem:[%s667_s3 + $0x18] sm:$0xff]  ;;  %v299_v52 = vstv %s670_s6  ;;  %v342_v9 = vlaneseq  ;;  %s358_s11 = sshll.u32 %s671_s7, 4  ;;  %vm346_vm8 = vcmask 1041409   ;;  %s359_s11 = int_to_ptr.hbm [resolvable:$true] %s358_s11 }
   0xd   :  { %v484_v14 = vld [vmem:[%s667_s3 + $0x58] sm:$0xff]  ;;  %v475_v16 = vld [vmem:[%s667_s3 + $0x10] sm:$0xff]  ;;  %v474_v19 = vld [vmem:[%s667_s3 + $0x8] sm:$0xff]  ;;  %vm349_vm9 = vcmask 58368  }
   0xe   :  { %249 = vmatpush.bf16.msra.mxu1 %v477_v10  ;;  %v468_v15 = vld [vmem:[%s666_s2 + $0x18] sm:$0xff]  ;;  %v483_v17 = vld [vmem:[%s667_s3 + $0x50] sm:$0xff]  ;;  %v482_v20 = vld [vmem:[%s667_s3 + $0x48] sm:$0xff] }
   0xf   :  { %262 = vmatpush.bf16.msra.mxu2 %v485_v11  ;;  %v467_v18 = vld [vmem:[%s666_s2 + $0x10] sm:$0xff]  ;;  %v466_v21 = vld [vmem:[%s666_s2 + $0x8] sm:$0xff]  ;;  %v473_v22 = vld [vmem:[%s667_s3] sm:$0xff] }
  0x10   :  { %98 = vmatpush.bf16.msra.mxu0 %v469_v12  ;;  %v481_v23 = vld [vmem:[%s667_s3 + $0x40] sm:$0xff]  ;;  %v113_v25 = vld.sshfl [vmem:[#allocation1 + $0x8] sm:$0xff pattern:$0x73625140] }
  0x11   :  { %v112_v24 = vld.sshfl [vmem:[#allocation1] sm:$0xff pattern:$0x73625140]  ;;  %v29_v28 = vld [vmem:[%s664_s0 + $0x8] sm:$0xff]  ;;  %v117_v30 = vpack.c.bf16 %v113_v25, %v113_v25 }
  0x12   :  { %250 = vmatpush.bf16.msra.mxu1 %v476_v13  ;;  %v465_v26 = vld [vmem:[%s666_s2] sm:$0xff]  ;;  %v116_v29 = vpack.c.bf16 %v112_v24, %v112_v24 }
  0x13   :  { %263 = vmatpush.bf16.msra.mxu2 %v484_v14  ;;  %v28_v27 = vld [vmem:[%s664_s0] sm:$0xff] }
  0x14   :  { %99 = vmatpush.bf16.msra.mxu0 %v468_v15  ;;  %v30_v31 = vpack.c.bf16 %v29_v28, %v28_v27  ;;  %v490_v39 = vld [vmem:[%s668_s4] ss:$0 sm:$0xff] }
  0x15   :  { %v491_v47 = vld [vmem:[%s669_s5] ss:$0 sm:$0xff]  ;;  %s530_s5 = smov [#allocation3]  }
  0x16   :  { %251 = vmatpush.bf16.msra.mxu1 %v475_v16  ;;  %v343_v16 = vand.u32 127, %v342_v9  ;;  %s356_s6 = sshll.u32 %s530_s5, 4  ;;  %s357_s6 = int_to_ptr.vmem [resolvable:$true] %s356_s6 }
  0x17   :  { %264 = vmatpush.bf16.msra.mxu2 %v483_v17 }
  0x18   :  { %100 = vmatpush.bf16.msra.mxu0 %v467_v18 }
  0x1a   :  { %252 = vmatpush.bf16.msra.mxu1 %v474_v19 }
  0x1b   :  { %265 = vmatpush.bf16.msra.mxu2 %v482_v20 }
  0x1c   :  { %101 = vmatpush.bf16.msra.mxu0 %v466_v21 }
  0x1e   :  { %253 = vmatpush.bf16.msra.mxu1 %v473_v22 }
  0x1f   :  { %266 = vmatpush.bf16.msra.mxu2 %v481_v23 }
  0x20   :  { %102 = vmatpush.bf16.msra.mxu0 %v465_v26 }
  0x21   :  { %254 = vmatmul.bf16.vlgmr.msra.gmra.mxu1 %v116_v29 }
  0x22   :  { %267 = vmatmul.bf16.vlgmr.msra.gmra.mxu2 %v117_v30 }
  0x23   :  { %103 = vmatmul.bf16.vlgmr.msra.gmra.mxu0 %v30_v31 }
  0x9e   :  { %v255_v32 = vpop.f32.mrf.mxu1 }
  0xa0   :  { %v104_v33 = vpop.f32.mrf.mxu0 }
  0xa5   :  { %v268_v34 = vpop.f32.mrf.mxu2 }
  0xa6   :  { %v269_v35 = vadd.f32 %v268_v34, %v255_v32  ;;  %v257_v36 = vpop.f32.mrf.mxu1 }
  0xa8   :  { %v273_v37 = vrot.slane %v269_v35, 1  ;;  %v274_v38 = vperm.slane %v269_v35, 0  ;;  %v106_v42 = vpop.f32.mrf.mxu0 }
  0xaa   :  { %v278_v40 = vadd.f32 %v274_v38, %v104_v33  ;;  %v275_v41 = vperm.slane %v273_v37, 0 }
  0xac   :  { %v279_v43 = vadd.f32 %v275_v41, %v106_v42  ;;  %v284_v44 = vadd.f32 %v490_v39, %v278_v40 }
  0xad   :  { %v270_v45 = vpop.f32.mrf.mxu2 }
  0xae   :  { %492 = vtanh.f32 %v284_v44  ;;  %v285_v46 = vadd.f32 %v490_v39, %v279_v43 }
  0xb0   :  { %494 = vtanh.f32 %v285_v46 }
  0xb4   :  { %v493_v48 = vpop.eup %492 }
  0xb5   :  { %v292_v49 = vmul.f32 %v493_v48, %v491_v47 }
  0xb6   :  { %v495_v50 = vpop.eup %494 }
  0xb7   :  { %294 = vadd.xlane.f32.xlu0 %v292_v49  ;;  %v293_v51 = vmul.f32 %v495_v50, %v491_v47 }
  0xbf   :  { %296 = vadd.xlane.f32.xlu0 %v293_v51 }
 0x12a   :  { %v295_v53 = vpop.xlane.xlu0 %294 }
 0x12b   :  { %v300_v54 = vadd.f32 %v299_v52, %v295_v53 }
 0x12d   :  { %v463_v55 = vmul.f32 -1.442695, %v300_v54 }
 0x12f   :  { %496 = vpow2.f32 %v463_v55 }
 0x132   :  { %v297_v56 = vpop.xlane.xlu0 %296 }
 0x133   :  { %v301_v57 = vadd.f32 %v299_v52, %v297_v56 }
 0x135   :  { %v497_v58 = vpop.eup %496  ;;  %v464_v59 = vmul.f32 -1.442695, %v301_v57 }
 0x136   :  { %v308_v60 = vadd.f32 1.0, %v497_v58 }
 0x137   :  { %498 = vpow2.f32 %v464_v59 }
 0x138   :  { %500 = vrcp.f32 %v308_v60  ;;  %v321_v6 = vand.u32 2147483648, %v308_v60  ;;  %vm315_vm1 = vweird.f32 %v308_v60  ;;  %v319_v8 = vand.u32 2147483647, %v308_v60 }
 0x13a   :  { %v322_v14 = vor.u32 1.1754944e-38, %v321_v6  ;;  %vm320_vm4 = vcmp.eq.f32.partialorder %v319_v8, 8.507059e+37 }
 0x13d   :  { %v499_v61 = vpop.eup %498 }
 0x13e   :  { %v501_v62 = vpop.eup %500  ;;  %v309_v63 = vadd.f32 1.0, %v499_v61 }
 0x13f   :  { %v311_v0 = vmul.f32 %v501_v62, %v308_v60  ;;  %vm316_vm0 = vweird.f32 %v501_v62 }
 0x140   :  { %502 = vrcp.f32 %v309_v63  ;;  %vm317_vm2 = vmor %vm315_vm1, %vm316_vm0  ;;  %v336_v10 = vand.u32 2147483648, %v309_v63  ;;  %v334_v13 = vand.u32 2147483647, %v309_v63  ;;  %vm330_vm5 = vweird.f32 %v309_v63 }
 0x141   :  { %v312_v1 = vsub.f32 1.0, %v311_v0 }
 0x142   :  { %v337_v18 = vor.u32 1.1754944e-38, %v336_v10  ;;  %vm335_vm7 = vcmp.eq.f32.partialorder %v334_v13, 8.507059e+37 }
 0x143   :  { %v313_v2 = vmul.f32 %v501_v62, %v312_v1 }
 0x145   :  { %v314_v5 = vadd.f32 %v501_v62, %v313_v2 }
 0x146   :  { %v503_v3 = vpop.eup %502 }
 0x147   :  { %v326_v4 = vmul.f32 %v503_v3, %v309_v63  ;;  %v318_v12 = vsel %vm317_vm2, %v501_v62, %v314_v5  ;;  %vm331_vm3 = vweird.f32 %v503_v3 }
 0x148   :  { %v323_v17 = vsel %vm320_vm4, %v322_v14, %v318_v12  ;;  %vm332_vm6 = vmor %vm330_vm5, %vm331_vm3 }
 0x149   :  { %v327_v7 = vsub.f32 1.0, %v326_v4  ;;  %v344_v21 = vperm.slane %v323_v17, %v343_v16 }
 0x14b   :  { %v328_v11 = vmul.f32 %v503_v3, %v327_v7 }
 0x14d   :  { %v329_v15 = vadd.f32 %v503_v3, %v328_v11 }
 0x14f   :  { %v333_v19 = vsel %vm332_vm6, %v503_v3, %v329_v15 }
 0x150   :  { %v338_v20 = vsel %vm335_vm7, %v337_v18, %v333_v19 }
 0x151   :  { %v345_v22 = vperm.slane %v338_v20, %v343_v16 }
 0x153   :  { %v347_v23 = vsel %vm346_vm8, %v345_v22, %v344_v21 }
 0x154   :  { %350 = vst.msk [vmem:[#allocation3] sm:$0x3] %vm349_vm9, %v347_v23 }
 0x155   :  { %361 = dma.vmem_to_hbm [thread:$0]  %s357_s6, 32, %s359_s11, [#allocation4]  }
 0x156   :  { %528 = dma.done.wait [#allocation4], 32  }
 0x157   :  { %529 = vsyncadd [#allocation4], 4294967264 }
 0x158   :  { %366 = vsyncpa [#allocation4], 1 }

</bundles_post_ra>
